<compile_context>
chip_gen: v6e
topology: v6e:2x2x1
jax: 0.10.0
libtpu: 0.0.40
codegen_flags: <defaults>
</compile_context>

<pallas_src>
import math
import functools

import jax
import jax.numpy as jnp
from jax import lax
from jax.experimental import pallas as pl
from jax.experimental.pallas import tpu as pltpu


# ----------------------------------------------------------------------------
# Helpers
# ----------------------------------------------------------------------------
def _vmem_limit_bytes():
    """Generation-aware VMEM budget: ~3/4 of physical, capped at 64 MiB."""
    try:
        cap = int(getattr(pltpu.get_tpu_info(), "vmem_capacity_bytes", 0))
    except Exception:
        cap = 0
    if cap <= 0:
        cap = 64 * 1024 * 1024
    return min((cap * 3) // 4, 64 * 1024 * 1024)


def _pick_sublane_tile(dim, target, multiple=8):
    """Largest multiple of `multiple` dividing `dim` and <= target, else dim."""
    if dim <= target:
        return dim
    best = None
    t = multiple
    while t <= target:
        if dim % t == 0:
            best = t
        t += multiple
    return best if best is not None else dim


def _pick_lane_tile(dim, target):
    """Largest lane tile <= target dividing `dim`, preferring multiples of 256
    (v6e/v7x MXU granularity), falling back to 128, then the full dim."""
    if dim <= target:
        return dim
    for mult in (256, 128):
        best = None
        t = mult
        while t <= target:
            if dim % t == 0:
                best = t
            t += mult
        if best is not None:
            return best
    return dim


def _pick_head_block(num_heads, head_dim, max_width=512):
    """Largest divisor hb of num_heads with hb*head_dim a multiple of 128 and
    <= max_width lanes (wide lane-dense stores, fewer grid steps)."""
    candidates = [hb for hb in range(1, num_heads + 1)
                  if num_heads % hb == 0 and (hb * head_dim) % 128 == 0]
    if not candidates:
        return num_heads
    best = candidates[0]
    for hb in candidates:
        if hb * head_dim <= max_width:
            best = hb
    return best


# ----------------------------------------------------------------------------
# Kernel 1: fused QKV projection   out = x @ Wqkv + bqkv
#   x:     (M, D)   bf16   (M = B*S)
#   Wqkv:  (D, 3D)  bf16   (head-group interleaved [Wq_g|Wk_g|Wv_g] columns,
#                           scale folded into the Wq columns)
#   bqkv:  (1, 3D)  f32
#   out:   (M, 3D)  bf16
# Single-block reduction (tk == D): no accumulator scratch, no pl.when, grid
# is purely parallel over (M/tm, N/tn).
# ----------------------------------------------------------------------------
def _qkv_proj_kernel(x_ref, w_ref, b_ref, o_ref):
    acc = jnp.dot(x_ref[...], w_ref[...], preferred_element_type=jnp.float32)
    o_ref[...] = (acc + b_ref[...]).astype(o_ref.dtype)


def qkv_projection(x2d, w_qkv, b_qkv, *, tm_target=512, tn_target=1024):
    M, D = x2d.shape
    N = w_qkv.shape[1]
    tm = _pick_sublane_tile(M, tm_target, 8)
    tn = _pick_lane_tile(N, tn_target)
    grid = (M // tm, N // tn)

    return pl.pallas_call(
        _qkv_proj_kernel,
        out_shape=jax.ShapeDtypeStruct((M, N), jnp.bfloat16),
        grid_spec=pltpu.PrefetchScalarGridSpec(
            num_scalar_prefetch=0,
            grid=grid,
            in_specs=[
                pl.BlockSpec((tm, D), lambda i, j: (i, 0)),
                pl.BlockSpec((D, tn), lambda i, j: (0, j)),
                pl.BlockSpec((1, tn), lambda i, j: (0, j)),
            ],
            out_specs=pl.BlockSpec((tm, tn), lambda i, j: (i, j)),
        ),
        compiler_params=pltpu.CompilerParams(
            dimension_semantics=("parallel", "parallel"),
            vmem_limit_bytes=_vmem_limit_bytes(),
        ),
    )(x2d, w_qkv, b_qkv)


# ----------------------------------------------------------------------------
# Kernel 2: scaled-dot-product attention, Hb heads per grid step.
#   qkv_ref: (1, S, 3*width) bf16  -- ONE contiguous column slice of the
#            head-group-interleaved QKV buffer ([Q_g | K_g | V_g]); Q columns
#            already carry the 1/sqrt(Dh) scale.
#   m_ref:   (1, 1, 1, S) f32 additive mask (broadcast over queries)
#   o_ref:   (1, S, width) bf16 column slice of the final (B, S, D) context
# ----------------------------------------------------------------------------
def _sdpa_kernel(qkv_ref, m_ref, o_ref, *, num_heads_per_block, head_dim):
    Hb, Dh = num_heads_per_block, head_dim
    width = Hb * Dh

    q = qkv_ref[0, :, 0:width]               # (S, width) bf16, pre-scaled
    k = qkv_ref[0, :, width:2 * width]       # (S, width) bf16
    v = qkv_ref[0, :, 2 * width:3 * width]   # (S, width) bf16
    mask = m_ref[0, 0]                       # (1, S) f32 additive

    # TODO(synk): flash-style online softmax with a query/KV grid axis is
    # needed for S >~ 1k (bounds the (S, S) f32 score tile; critical on v7x's
    # 64 MiB VMEM).  This path materializes (S, S) per head.
    for h in range(Hb):                      # static unrolled loop over heads
        lo = h * Dh
        q_h = q[:, lo:lo + Dh]
        k_h = k[:, lo:lo + Dh]
        v_h = v[:, lo:lo + Dh]

        # q_h @ k_h^T without materializing a transposed K tile.
        s = lax.dot_general(q_h, k_h, (((1,), (1,)), ((), ())),
                            preferred_element_type=jnp.float32)   # (S, S) f32
        s = s + mask                                              # broadcast

        m_max = jnp.max(s, axis=-1, keepdims=True)
        p = jnp.exp(s - m_max)
        denom = jnp.sum(p, axis=-1, keepdims=True)
        p = p * pl.reciprocal(denom, approx=True)                 # EUP slot

        ctx = jnp.dot(p.astype(v_h.dtype), v_h,
                      preferred_element_type=jnp.float32)         # (S, Dh) f32
        # Direct column-slice store into the lane-dense output block (no
        # concatenate epilogue / extra (S, width) copy).
        o_ref[0, :, lo:lo + Dh] = ctx.astype(o_ref.dtype)


def sdpa_attention(qkv, mask, num_heads, head_dim, head_block):
    """qkv: (B, S, 3D) bf16 head-group interleaved; mask: (B,1,1,S) f32.
    Returns context in final (B, S, D) layout, bf16."""
    B, S, threeD = qkv.shape
    D = threeD // 3
    Hb = head_block
    width = Hb * head_dim
    G = num_heads // Hb
    assert Hb * head_dim * G == D
    assert width % 128 == 0, "head-group width must be a multiple of 128 lanes"

    kernel = functools.partial(_sdpa_kernel, num_heads_per_block=Hb,
                               head_dim=head_dim)

    return pl.pallas_call(
        kernel,
        out_shape=jax.ShapeDtypeStruct((B, S, D), jnp.bfloat16),
        grid_spec=pltpu.PrefetchScalarGridSpec(
            num_scalar_prefetch=0,
            grid=(B, G),
            in_specs=[
                # One contiguous [Q_g | K_g | V_g] window: a single DMA per step.
                pl.BlockSpec((1, S, 3 * width), lambda b, g: (b, 0, g)),
                pl.BlockSpec((1, 1, 1, S), lambda b, g: (b, 0, 0, 0)),
            ],
            # Each head group writes its own lane-dense column slice of (B,S,D).
            out_specs=pl.BlockSpec((1, S, width), lambda b, g: (b, 0, g)),
        ),
        compiler_params=pltpu.CompilerParams(
            dimension_semantics=("parallel", "parallel"),
            vmem_limit_bytes=_vmem_limit_bytes(),
        ),
    )(qkv, mask)


# ----------------------------------------------------------------------------
# Module wrapper: parameters + glue.  All layout work (head split, Q/K/V
# interleave, scale folding) is done once at init time on the weights.
# ----------------------------------------------------------------------------
class RobertaSdpaSelfAttentionPallas:
    def __init__(self, hidden_size, num_attention_heads, key):
        assert hidden_size % num_attention_heads == 0
        self.hidden_size = hidden_size
        self.num_heads = num_attention_heads
        self.head_dim = hidden_size // num_attention_heads

        kq, kk, kv, kbq, kbk, kbv = jax.random.split(key, 6)
        s = 0.02
        # torch nn.Linear stores weight as (out, in); we keep (in, out) so that
        # y = x @ W + b matches y = x @ weight.T + bias.
        self.wq = s * jax.random.normal(kq, (hidden_size, hidden_size), jnp.float32)
        self.wk = s * jax.random.normal(kk, (hidden_size, hidden_size), jnp.float32)
        self.wv = s * jax.random.normal(kv, (hidden_size, hidden_size), jnp.float32)
        self.bq = s * jax.random.normal(kbq, (hidden_size,), jnp.float32)
        self.bk = s * jax.random.normal(kbk, (hidden_size,), jnp.float32)
        self.bv = s * jax.random.normal(kbv, (hidden_size,), jnp.float32)

        # --- init-time layout work ------------------------------------------
        # Head group size: largest hb with hb*Dh a multiple of 128 and <= 512
        # lanes (wide lane-dense stores, fewer SDPA grid steps).
        self.head_block = _pick_head_block(self.num_heads, self.head_dim)
        width = self.head_block * self.head_dim
        G = self.num_heads // self.head_block

        # Fold attention scale into the query projection.
        scale = 1.0 / math.sqrt(self.head_dim)
        wq_s = self.wq * scale
        bq_s = self.bq * scale

        # Interleave per head group: [Wq_g | Wk_g | Wv_g] columns so SDPA can
        # fetch a group's Q, K and V with one contiguous DMA.
        w_groups, b_groups = [], []
        for g in range(G):
            lo, hi = g * width, (g + 1) * width
            w_groups += [wq_s[:, lo:hi], self.wk[:, lo:hi], self.wv[:, lo:hi]]
            b_groups += [bq_s[lo:hi], self.bk[lo:hi], self.bv[lo:hi]]
        # bf16 weights for the MXU, f32 bias added at f32 accumulation time.
        self.w_fused = jnp.concatenate(w_groups, axis=1).astype(jnp.bfloat16)   # (D, 3D)
        self.b_fused = jnp.concatenate(b_groups)[None, :].astype(jnp.float32)   # (1, 3D)

    def __call__(self, hidden_states, attention_mask=None):
        B, S, D = hidden_states.shape
        assert D == self.hidden_size

        # --- QKV projection (single-reduction-block Pallas matmul) ---
        x2d = hidden_states.reshape(B * S, D).astype(jnp.bfloat16)
        qkv = qkv_projection(x2d, self.w_fused, self.b_fused)   # (B*S, 3D) bf16
        qkv = qkv.reshape(B, S, 3 * D)                          # metadata-only

        if attention_mask is None:
            attention_mask = jnp.zeros((B, 1, 1, S), jnp.float32)
        attention_mask = attention_mask.astype(jnp.float32)

        # TODO(synk): attention-probs dropout (training), zero_value_index,
        # past_key_value / cross-attention / relative-position paths are the
        # non-SDPA fallbacks and are not part of this kernel.
        attn_output = sdpa_attention(qkv, attention_mask, self.num_heads,
                                     self.head_dim, self.head_block)
        return (attn_output,)


# ----------------------------------------------------------------------------
# Pure-JAX reference (independent math: original weights, scale applied to q)
# ----------------------------------------------------------------------------
def reference_forward(mod, hidden_states, attention_mask=None):
    B, S, D = hidden_states.shape
    H, Dh = mod.num_heads, mod.head_dim

    x = hidden_states.astype(jnp.bfloat16)

    def proj(w, b):
        y = jnp.dot(x, w.astype(jnp.bfloat16),
                    preferred_element_type=jnp.float32) + b
        return y.astype(jnp.bfloat16)

    q, k, v = proj(mod.wq, mod.bq), proj(mod.wk, mod.bk), proj(mod.wv, mod.bv)

    def split_heads(t):
        return t.reshape(B, S, H, Dh).transpose(0, 2, 1, 3)

    q, k, v = split_heads(q), split_heads(k), split_heads(v)
    scale = 1.0 / math.sqrt(Dh)

    scores = jnp.einsum("bhqd,bhkd->bhqk", q.astype(jnp.float32),
                        k.astype(jnp.float32)) * scale
    if attention_mask is not None:
        scores = scores + attention_mask
    probs = jax.nn.softmax(scores, axis=-1)
    ctx = jnp.einsum("bhqk,bhkd->bhqd", probs.astype(jnp.bfloat16), v,
                     preferred_element_type=jnp.float32)
    return ctx.transpose(0, 2, 1, 3).reshape(B, S, D)


if __name__ == "__main__":
    # Small but tiling-legal shapes: hidden (lane) dim a multiple of 128.
    B, S, D, H = 2, 8, 128, 4

    key = jax.random.PRNGKey(0)
    k_params, k_x = jax.random.split(key, 2)

    module = RobertaSdpaSelfAttentionPallas(hidden_size=D,
                                            num_attention_heads=H,
                                            key=k_params)

    hidden_states = jax.random.normal(k_x, (B, S, D), jnp.float32)
    # HF-style additive mask: mask out the last key position of batch 1.
    attention_mask = jnp.zeros((B, 1, 1, S), jnp.float32)
    attention_mask = attention_mask.at[1, 0, 0, -1].set(-1e9)

    (out,) = module(hidden_states, attention_mask)
    out = jax.block_until_ready(out)
    assert out.shape == (B, S, D)

    ref = reference_forward(module, hidden_states, attention_mask)
    diff = jnp.max(jnp.abs(out.astype(jnp.float32) - ref.astype(jnp.float32)))
    assert jnp.allclose(out.astype(jnp.float32), ref.astype(jnp.float32),
                        atol=2e-2, rtol=2e-2), float(diff)

    print("KERNEL_OK")
</pallas_src>

<mosaic_0001>
module attributes {stable_mosaic.version = 11 : i64} {
  func.func @_qkv_proj_kernel(%arg0: i32, %arg1: i32, %arg2: memref<16x128xbf16, #tpu.memory_space<vmem>>, %arg3: memref<128x384xbf16, #tpu.memory_space<vmem>>, %arg4: memref<1x384xf32, #tpu.memory_space<vmem>>, %arg5: memref<16x384xbf16, #tpu.memory_space<vmem>>) attributes {dimension_semantics = [#tpu.dimension_semantics<parallel>, #tpu.dimension_semantics<parallel>], iteration_bounds = array<i64: 1, 1>, scalar_prefetch = 0 : i64, scratch_operands = 0 : i64, tpu.core_type = #tpu.core_type<tc>, window_params = [{transform_indices = @transform_0, window_bounds = array<i64: 16, 128>}, {transform_indices = @transform_1, window_bounds = array<i64: 128, 384>}, {transform_indices = @transform_2, window_bounds = array<i64: 1, 384>}, {transform_indices = @transform_3, window_bounds = array<i64: 16, 384>}]} {
    %c0 = arith.constant 0 : index
    %c0_0 = arith.constant 0 : index
    %0 = vector.load %arg2[%c0, %c0_0] : memref<16x128xbf16, #tpu.memory_space<vmem>>, vector<16x128xbf16>
    %c0_1 = arith.constant 0 : index
    %c0_2 = arith.constant 0 : index
    %1 = vector.load %arg3[%c0_1, %c0_2] : memref<128x384xbf16, #tpu.memory_space<vmem>>, vector<128x384xbf16>
    %cst = arith.constant dense<0.000000e+00> : vector<16x384xf32>
    %2 = tpu.matmul %0, %1, %cst {dimension_numbers = #tpu.dot_dimension_numbers<[1], [0], [0], [1], [0, 0, 1, 1], [], []>} : vector<16x128xbf16>, vector<128x384xbf16>, vector<16x384xf32> -> vector<16x384xf32>
    %c0_3 = arith.constant 0 : index
    %c0_4 = arith.constant 0 : index
    %3 = vector.load %arg4[%c0_3, %c0_4] : memref<1x384xf32, #tpu.memory_space<vmem>>, vector<1x384xf32>
    %4 = vector.broadcast %3 : vector<1x384xf32> to vector<16x384xf32>
    %5 = arith.addf %2, %4 : vector<16x384xf32>
    %6 = arith.truncf %5 : vector<16x384xf32> to vector<16x384xbf16>
    %c0_5 = arith.constant 0 : index
    %c0_6 = arith.constant 0 : index
    %7 = vector.load %arg5[%c0_5, %c0_6] : memref<16x384xbf16, #tpu.memory_space<vmem>>, vector<16x384xbf16>
    tpu.vector_store %arg5[%c0_5, %c0_6], %6 {strides = array<i32>} : memref<16x384xbf16, #tpu.memory_space<vmem>>, vector<16x384xbf16>,
    return
  }
  func.func @transform_0(%arg0: i32, %arg1: i32) -> (i32, i32) {
    %c0_i32 = arith.constant 0 : i32
    %c0_i32_0 = arith.constant 0 : i32
    return %arg0, %c0_i32 : i32, i32
  }
  func.func @transform_1(%arg0: i32, %arg1: i32) -> (i32, i32) {
    %c0_i32 = arith.constant 0 : i32
    %c0_i32_0 = arith.constant 0 : i32
    return %c0_i32, %arg1 : i32, i32
  }
  func.func @transform_2(%arg0: i32, %arg1: i32) -> (i32, i32) {
    %c0_i32 = arith.constant 0 : i32
    %c0_i32_0 = arith.constant 0 : i32
    return %c0_i32, %arg1 : i32, i32
  }
  func.func @transform_3(%arg0: i32, %arg1: i32) -> (i32, i32) {
    %c0_i32 = arith.constant 0 : i32
    return %arg0, %arg1 : i32, i32
  }
}

</mosaic_0001>

<bundles_post_ra>
// kernel: tpu_custom_call.1
= control target key start
LH: loop header
LB: loop body
LE: loop exit
PB: predicated region body
PF: predicated region fallthrough
CT: control target
= control target key end

     0   :  { %8 = vsyncpa [#allocation3], 0  ;;  %s574_s0 = inlined_call_operand.hbm [shape: bf16[16,128], index: 0, kind: input, shape index: {}]   ;;  %s575_s1 = inlined_call_operand.hbm [shape: bf16[128,384], index: 1, kind: input, shape index: {}]   ;;  %s576_s2 = inlined_call_operand.vmem [shape: f32[1,384], index: 2, kind: input, shape index: {}]   ;;  %s577_s3 = inlined_call_operand.hbm [shape: bf16[16,384], index: 3, kind: output, shape index: {}]  }
   0x1   :  { %9 = vsyncpa [#allocation6], 0 }
   0x2   :  { %10 = vsyncpa [#allocation4], 0  ;;  %s526_s12 = smov [#allocation2]  }
   0x3   :  { %s16_s13 = sshll.u32 %s526_s12, 4  ;;  %s17_s13 = int_to_ptr.vmem [resolvable:$true] %s16_s13 }
   0x4   :  { %s468_s14 = scalar_lea.vmem %s17_s13, 128  ;;  %p473_p1 = scmp.lt.s32.totalorder %s17_s13, %s17_s13 }
   0x5   :  { %p469_p0 = scmp.ne.s32.totalorder %s17_s13, %s468_s14  ;;  %p474_p2 = scmp.lt.s32.totalorder %s468_s14, %s468_s14 }
   0x7   :  { %p475_p3 = por %p474_p2, %p473_p1 }
   0x9   :  { %p476_p4 = pnand %p475_p3, %p469_p0 }
   0xb   :  { %479 = shalt.err (!%p476_p4)
}
   0xc   :  { %s527_s15 = smov 64   ;;  %s528_s16 = smov 4  }
   0xd   :  { %22 = dma.hbm_to_vmem [thread:$0]  %s574_s0, 128, %s17_s13, [#allocation3], %s527_s15, %s527_s15, %s528_s16  }
   0xe   :  { %s529_s19 = smov [#allocation5]  }
   0xf   :  { %s28_s20 = sshll.u32 %s529_s19, 4  ;;  %s29_s20 = int_to_ptr.vmem [resolvable:$true] %s28_s20 }
  0x10   :  { %s488_s21 = scalar_lea.vmem %s29_s20, 3072  ;;  %p493_p6 = scmp.lt.s32.totalorder %s29_s20, %s29_s20 }
  0x11   :  { %p489_p5 = scmp.ne.s32.totalorder %s29_s20, %s488_s21  ;;  %p494_p7 = scmp.lt.s32.totalorder %s488_s21, %s488_s21 }
  0x13   :  { %p495_p8 = por %p494_p7, %p493_p6 }
  0x15   :  { %p496_p9 = pnand %p495_p8, %p489_p5 }
  0x17   :  { %499 = shalt.err (!%p496_p9)
}
  0x18   :  { %s530_s22 = smov 192   ;;  %s531_s23 = smov 12  }
  0x19   :  { %34 = dma.hbm_to_vmem [thread:$0]  %s575_s1, 3072, %s29_s20, [#allocation6], %s530_s22, %s530_s22, %s531_s23  }
  0x1a   :  { %520 = dma.done.wait [#allocation3], 128  }
  0x1b   :  { %521 = vsyncadd [#allocation3], 4294967168 }
  0x1c   :  { %522 = dma.done.wait [#allocation6], 3072  }
  0x1d   :  { %523 = vsyncadd [#allocation6], 4294964224  ;;  %v532_v0 = vmov 0.0   ;;  %vm533_vm0 = vmmov 0   ;;  %v534_v1 = vmov 0   ;;  %v459_v26 = vld [vmem:[#allocation2] sm:$0xff]   ;;  %v80_v27 = vlaneseq }
  0x1e   :  { %397 = vmatprep.subr.bf16.mxu1 %v532_v0  ;;  %413 = vmatprep.mubr.msk.bf16.mxu1 %vm533_vm0, %v532_v0  ;;  %v427_v2 = vld [vmem:[#allocation5 + $0xac] ss:$12 sps:$4 sm:$0xff]   ;;  %v429_v3 = vld [vmem:[#allocation5 + $0xb0] ss:$12 sps:$4 sm:$0xff]   ;;  %v430_v4 = vld [vmem:[#allocation5 + $0xa8] ss:$12 sps:$4 sm:$0xff]  }
  0x1f   :  { %261 = vmatprep.mubr.bf16.mxu0 %v534_v1  ;;  %229 = vmatprep.subr.bf16.mxu0 %v427_v2  ;;  %v431_v5 = vld [vmem:[#allocation5 + $0x94] ss:$12 sps:$4 sm:$0xff]   ;;  %v433_v6 = vld [vmem:[#allocation5 + $0x98] ss:$12 sps:$4 sm:$0xff]   ;;  %v434_v7 = vld [vmem:[#allocation5 + $0x90] ss:$12 sps:$4 sm:$0xff]  }
  0x20   :  { %398 = vmatpush3.bf16.msra.mxu1 %v429_v3  ;;  %230 = vmatpush1.bf16.msra.mxu0 %v430_v4  ;;  %v435_v8 = vld [vmem:[#allocation5 + $0x7c] ss:$12 sps:$4 sm:$0xff]   ;;  %v437_v9 = vld [vmem:[#allocation5 + $0x80] ss:$12 sps:$4 sm:$0xff]   ;;  %v438_v10 = vld [vmem:[#allocation5 + $0x78] ss:$12 sps:$4 sm:$0xff]  }
  0x21   :  { %399 = vmatprep.subr.bf16.mxu1 %v532_v0  ;;  %231 = vmatprep.subr.bf16.mxu0 %v431_v5  ;;  %v439_v11 = vld [vmem:[#allocation5 + $0x64] ss:$12 sps:$4 sm:$0xff]   ;;  %v441_v12 = vld [vmem:[#allocation5 + $0x68] ss:$12 sps:$4 sm:$0xff]   ;;  %v442_v13 = vld [vmem:[#allocation5 + $0x60] ss:$12 sps:$4 sm:$0xff]  }
  0x22   :  { %v443_v14 = vld [vmem:[#allocation5 + $0x4c] ss:$12 sps:$4 sm:$0xff]   ;;  %v445_v15 = vld [vmem:[#allocation5 + $0x50] ss:$12 sps:$4 sm:$0xff]   ;;  %v446_v16 = vld [vmem:[#allocation5 + $0x48] ss:$12 sps:$4 sm:$0xff]  }
  0x23   :  { %v447_v17 = vld [vmem:[#allocation5 + $0x34] ss:$12 sps:$4 sm:$0xff]   ;;  %v449_v18 = vld [vmem:[#allocation5 + $0x38] ss:$12 sps:$4 sm:$0xff]   ;;  %v450_v19 = vld [vmem:[#allocation5 + $0x30] ss:$12 sps:$4 sm:$0xff]  }
  0x24   :  { %400 = vmatpush3.bf16.msra.mxu1 %v433_v6  ;;  %232 = vmatpush1.bf16.msra.mxu0 %v434_v7  ;;  %v451_v20 = vld [vmem:[#allocation5 + $0x1c] ss:$12 sps:$4 sm:$0xff]   ;;  %v453_v21 = vld [vmem:[#allocation5 + $0x20] ss:$12 sps:$4 sm:$0xff]   ;;  %v454_v22 = vld [vmem:[#allocation5 + $0x18] ss:$12 sps:$4 sm:$0xff]  }
  0x25   :  { %401 = vmatprep.subr.bf16.mxu1 %v532_v0  ;;  %233 = vmatprep.subr.bf16.mxu0 %v435_v8  ;;  %v455_v23 = vld [vmem:[#allocation5 + $0x4] ss:$12 sps:$4 sm:$0xff]   ;;  %v457_v24 = vld [vmem:[#allocation5 + $0x8] ss:$12 sps:$4 sm:$0xff]   ;;  %v458_v25 = vld [vmem:[#allocation5] ss:$12 sps:$4 sm:$0xff]  }
  0x26   :  { %v81_v28 = vshrl.u32 %v80_v27, 7  ;;  %v78_v30 = vld [vmem:[%s576_s2] sm:$0x7]  ;;  %s535_s2 = smov [#allocation7]  }
  0x27   :  { %s342_s26 = sshll.u32 %s535_s2, 4  ;;  %s343_s26 = int_to_ptr.vmem [resolvable:$true] %s342_s26 }
  0x28   :  { %402 = vmatpush3.bf16.msra.mxu1 %v437_v9  ;;  %234 = vmatpush1.bf16.msra.mxu0 %v438_v10  ;;  %v90_v29 = vsub.s32 2, %v81_v28  ;;  %v82_v31 = vsub.s32 0, %v81_v28  ;;  %v86_v32 = vsub.s32 1, %v81_v28  ;;  %s500_s27 = scalar_lea.vmem %s343_s26, 384  ;;  %p505_p11 = scmp.lt.s32.totalorder %s343_s26, %s343_s26 }
  0x29   :  { %403 = vmatprep.subr.bf16.mxu1 %v532_v0  ;;  %235 = vmatprep.subr.bf16.mxu0 %v439_v11  ;;  %p501_p10 = scmp.ne.s32.totalorder %s343_s26, %s500_s27  ;;  %p506_p12 = scmp.lt.s32.totalorder %s500_s27, %s500_s27 }
  0x2a   :  { %v91_v33 = vrot.slane %v78_v30, %v90_v29  ;;  %v83_v35 = vrot.slane %v78_v30, %v82_v31  ;;  %v87_v36 = vrot.slane %v78_v30, %v86_v32 }
  0x2b   :  { %p507_p13 = por %p506_p12, %p505_p11 }
  0x2c   :  { %404 = vmatpush3.bf16.msra.mxu1 %v441_v12  ;;  %236 = vmatpush1.bf16.msra.mxu0 %v442_v13 }
  0x2d   :  { %405 = vmatprep.subr.bf16.mxu1 %v532_v0  ;;  %237 = vmatprep.subr.bf16.mxu0 %v443_v14  ;;  %p508_p0 = pnand %p507_p13, %p501_p10 }
  0x30   :  { %406 = vmatpush3.bf16.msra.mxu1 %v445_v15  ;;  %238 = vmatpush1.bf16.msra.mxu0 %v446_v16 }
  0x31   :  { %407 = vmatprep.subr.bf16.mxu1 %v532_v0  ;;  %239 = vmatprep.subr.bf16.mxu0 %v447_v17 }
  0x34   :  { %408 = vmatpush3.bf16.msra.mxu1 %v449_v18  ;;  %240 = vmatpush1.bf16.msra.mxu0 %v450_v19 }
  0x35   :  { %409 = vmatprep.subr.bf16.mxu1 %v532_v0  ;;  %241 = vmatprep.subr.bf16.mxu0 %v451_v20 }
  0x38   :  { %410 = vmatpush3.bf16.msra.mxu1 %v453_v21  ;;  %242 = vmatpush1.bf16.msra.mxu0 %v454_v22 }
  0x39   :  { %411 = vmatprep.subr.bf16.mxu1 %v532_v0  ;;  %243 = vmatprep.subr.bf16.mxu0 %v455_v23 }
  0x3c   :  { %412 = vmatpush3.bf16.msra.mxu1 %v457_v24  ;;  %244 = vmatpush1.bf16.msra.mxu0 %v458_v25 }
  0x3f   :  { %414 = vmatmul.mubr.bf16.vlgmr.msra.gmra.mxu1 %v459_v26  ;;  %262 = vmatmul.mubr.bf16.vlgmr.msra.gmra.mxu0 %v459_v26 }
  0xff   :  { %v306_v34 = vpop.f32.mrf.mxu1  ;;  %v263_v38 = vpop.f32.mrf.mxu0 }
 0x100   :  { %v307_v37 = vadd.f32 %v306_v34, %v91_v33  ;;  %v264_v42 = vadd.f32 %v263_v38, %v83_v35 }
 0x101   :  { %v415_v39 = vpop.f32.mrf.mxu1  ;;  %v265_v41 = vpop.f32.mrf.mxu0 }
 0x102   :  { %v385_v40 = vpack.c.bf16 %v307_v37, %v307_v37  ;;  %v266_v43 = vadd.f32 %v265_v41, %v87_v36 }
 0x103   :  { %v309_v44 = vpop.f32.mrf.mxu1  ;;  %v267_v46 = vpop.f32.mrf.mxu0 }
 0x104   :  { %334 = vst [vmem:[#allocation7 + $0x8] sm:$0xf] %v385_v40  ;;  %v310_v45 = vadd.f32 %v309_v44, %v91_v33  ;;  %v384_v47 = vpack.c.bf16 %v266_v43, %v264_v42  ;;  %v268_v51 = vadd.f32 %v267_v46, %v83_v35 }
 0x105   :  { %v416_v48 = vpop.f32.mrf.mxu1  ;;  %v269_v50 = vpop.f32.mrf.mxu0 }
 0x106   :  { %v387_v49 = vpack.c.bf16 %v310_v45, %v310_v45  ;;  %333 = vst [vmem:[#allocation7] sm:$0xff] %v384_v47  ;;  %v270_v52 = vadd.f32 %v269_v50, %v87_v36 }
 0x108   :  { %336 = vst [vmem:[#allocation7 + $0x14] sm:$0xf] %v387_v49  ;;  %v386_v53 = vpack.c.bf16 %v270_v52, %v268_v51 }
 0x10a   :  { %335 = vst [vmem:[#allocation7 + $0xc] sm:$0xff] %v386_v53 }
 0x10b   :  { %511 = shalt.err (!%p508_p0)
}
 0x10c   :  { %348 = dma.vmem_to_hbm [thread:$0]  %s343_s26, 384, %s577_s3, [#allocation4], %s530_s22, %s530_s22, %s531_s23  }
 0x10d   :  { %524 = dma.done.wait [#allocation4], 384  }
 0x10e   :  { %525 = vsyncadd [#allocation4], 4294966912 }
 0x10f   :  { %352 = vsyncpa [#allocation3], 1 }
 0x110   :  { %353 = vsyncpa [#allocation6], 1 }
 0x111   :  { %354 = vsyncpa [#allocation4], 1 }

</bundles_post_ra>
